<compile_context>
chip_gen: v7x
topology: tpu7x:2x2x1
jax: 0.10.0
libtpu: 0.0.40
codegen_flags: <defaults>
</compile_context>

<pallas_src>
import math
import jax
import jax.numpy as jnp
from jax.experimental import pallas as pl
from jax.experimental.pallas import tpu as pltpu

LAYERS = (4, 8, 16, 32)   # cfg.layers
DOUBLE = False            # cfg.double
BATCHNORM = True          # cfg.batchnorm

_LANE = 128


def _ceil_to(x, m):
    return ((x + m - 1) // m) * m


def _cpad(c):
    # pad channel counts up to the 8-row sublane tile (real counts here are 1/4/8/16/32)
    return max(8, c)


def _block_cfg():
    cfgs = [(1, LAYERS[0], 1), (LAYERS[0], LAYERS[0], 2)]
    for prev, nxt in zip(LAYERS, LAYERS[1:]):
        if DOUBLE:
            cfgs.append((prev, nxt, 1))
            cfgs.append((nxt, nxt, 2))
        else:
            cfgs.append((prev, nxt, 2))
    return cfgs


def _conv_out(d, stride):
    # conv3x3x3 (pad=1) and avg_pool3d(k=1, stride) share this output size
    return (d - 1) // stride + 1


# --------------------------------------------------------------------------------------
# pltpu.roll direction probe: we need result[:, j] = x[:, (j + off) % W].  jnp.roll
# semantics would be shift = -off; probe once at startup so a sign-convention difference
# in the hardware rotate can never silently corrupt results.
# --------------------------------------------------------------------------------------
_ROLL_SIGN = 1  # +1 => pltpu.roll matches jnp.roll (out[i] = in[i - shift])


def _probe_roll_sign():
    def k(x_ref, o_ref):
        o_ref[...] = pltpu.roll(x_ref[...], 1, axis=1)

    x = jnp.broadcast_to(jax.lax.iota(jnp.float32, _LANE)[None, :], (8, _LANE))
    y = pl.pallas_call(k, out_shape=jax.ShapeDtypeStruct((8, _LANE), jnp.float32))(x)
    return 1 if float(y[0, 0]) == float(_LANE - 1) else -1


def _shift_lanes(x, off):
    """result[:, j] = x[:, (j + off) % W].  Circular wrap only ever lands on masked
    border / alignment-tail columns, so it never affects valid output positions."""
    w = x.shape[-1]
    s = ((-off) if _ROLL_SIGN == 1 else off) % w
    if s == 0:
        return x
    return pltpu.roll(x, s, axis=1)


def _tap_offsets(dp, hp, wp):
    """Flat lane offsets of the 27 taps of a 3x3x3 / pad-1 conv on the padded grid."""
    offs = []
    for kd in range(3):
        for kh in range(3):
            for kw in range(3):
                offs.append((kd - 1) * hp * wp + (kh - 1) * wp + (kw - 1))
    return tuple(offs)


# --------------------------------------------------------------------------------------
# The fused BasicBlock kernel
# --------------------------------------------------------------------------------------
def _make_block_kernel(stride1, n_out, sp, offs):
    n_taps = len(offs)

    def kernel(src_ref, w1_ref, b1_ref, w2_ref, b2_ref, inj_ref, mask_ref, y_ref):
        mask = mask_ref[...]                               # (1, sp) f32: 1 interior, 0 border/tail
        if stride1:
            x = src_ref[...]                               # (Ci, sp) bf16, zero borders

        # ---- conv1 + folded BN1 (f32 accumulate on the MXU) ----
        acc = jnp.zeros((n_out, sp), jnp.float32)
        for t in range(n_taps):
            xt = _shift_lanes(x, offs[t]) if stride1 else src_ref[t]
            acc = acc + jnp.dot(w1_ref[t], xt, preferred_element_type=jnp.float32)
        h = jnp.maximum(acc + b1_ref[...], 0.0) * mask     # ReLU + zero the padded border
        hb = h.astype(jnp.bfloat16)                        # stays in VMEM, never hits HBM

        # ---- conv2 + folded BN2: 27-tap im2col done in-kernel via lane shifts ----
        acc2 = jnp.zeros((n_out, sp), jnp.float32)
        for t in range(n_taps):
            acc2 = acc2 + jnp.dot(w2_ref[t], _shift_lanes(hb, offs[t]),
                                  preferred_element_type=jnp.float32)

        # ---- residual = avg_pool(k=1, stride) of x + zero channel pad ----
        #      == the center tap of conv1's input, injected with a tiny identity matmul.
        res_src = x if stride1 else src_ref[13]
        res = jnp.dot(inj_ref[...], res_src, preferred_element_type=jnp.float32)

        out = jnp.maximum(acc2 + b2_ref[...] + res, 0.0) * mask
        y_ref[...] = out.astype(y_ref.dtype)

    return kernel


def fused_basic_block(src, w1, b1, w2, b2, inj, mask, *, stride1, co, offs, n_steps, sp):
    """One pallas_call per BasicBlock.

    src: stride1: (Ci, n_steps*sp) flat zero-bordered activations (bf16);
         else:    (27, Ci, n_steps*sp) pre-gathered stride-2 conv1 patches (bf16).
    Returns (co, n_steps*sp) bf16 flat padded-grid activations with zeroed borders.
    """
    kernel = _make_block_kernel(stride1, co, sp, offs)
    if stride1:
        ci = src.shape[0]
        src_spec = pl.BlockSpec((ci, sp), lambda i: (0, i))
    else:
        ci = src.shape[1]
        src_spec = pl.BlockSpec((27, ci, sp), lambda i: (0, 0, i))

    grid_spec = pltpu.PrefetchScalarGridSpec(
        num_scalar_prefetch=0,
        grid=(n_steps,),
        in_specs=[
            src_spec,
            pl.BlockSpec((27, co, ci), lambda i: (0, 0, 0)),   # weights resident across grid
            pl.BlockSpec((co, 1), lambda i: (0, 0)),
            pl.BlockSpec((27, co, co), lambda i: (0, 0, 0)),
            pl.BlockSpec((co, 1), lambda i: (0, 0)),
            pl.BlockSpec((co, ci), lambda i: (0, 0)),
            pl.BlockSpec((1, sp), lambda i: (0, 0)),
        ],
        out_specs=pl.BlockSpec((co, sp), lambda i: (0, i)),
    )
    return pl.pallas_call(
        kernel,
        out_shape=jax.ShapeDtypeStruct((co, n_steps * sp), jnp.bfloat16),
        grid_spec=grid_spec,
        compiler_params=pltpu.CompilerParams(dimension_semantics=("parallel",)),
    )(src, w1, b1, w2, b2, inj, mask)


# --------------------------------------------------------------------------------------
# JAX-side layout glue (small; no 27x HBM amplification of the big layers)
# --------------------------------------------------------------------------------------
def _prepare_input(x_ncdhw, ci_pad):
    """NCDHW f32 -> (Ci_pad, N*Sp) bf16 flat padded-grid slab with zero borders."""
    N, C, D, H, W = x_ncdhw.shape
    dp, hp, wp = D + 2, H + 2, W + 2
    sp_true = dp * hp * wp
    sp = _ceil_to(sp_true, _LANE)
    buf = jnp.zeros((ci_pad, N, dp, hp, wp), jnp.bfloat16)
    buf = buf.at[:C, :, 1:-1, 1:-1, 1:-1].set(
        jnp.transpose(x_ncdhw, (1, 0, 2, 3, 4)).astype(jnp.bfloat16))
    buf = buf.reshape(ci_pad, N, sp_true)
    buf = jnp.pad(buf, ((0, 0), (0, 0), (0, sp - sp_true))).reshape(ci_pad, N * sp)
    return buf, (D, H, W), sp


def _stride2_patches(y_flat, ci, n, in_dims, sp_in, out_dims, sp_out):
    """Gather the 27 stride-2 conv1 taps from the previous block's flat padded-grid
    output, laid out directly on the NEXT padded output grid (border cols don't-care).
    TODO(synk): this gather is the only remaining XLA im2col glue (4 small layers); an
    in-kernel version needs 5-D strided relayouts in Mosaic and was not worth the risk."""
    D, H, W = in_dims
    dpi, hpi, wpi = D + 2, H + 2, W + 2
    sp_in_true = dpi * hpi * wpi
    Do, Ho, Wo = out_dims
    dpo, hpo, wpo = Do + 2, Ho + 2, Wo + 2
    sp_out_true = dpo * hpo * wpo
    y = y_flat.reshape(ci, n, sp_in)[:, :, :sp_in_true].reshape(ci, n, dpi, hpi, wpi)
    y = jnp.pad(y, ((0, 0), (0, 0), (2, 2), (2, 2), (2, 2)))
    taps = []
    for kd in range(3):
        for kh in range(3):
            for kw in range(3):
                taps.append(y[:, :,
                              kd:kd + 2 * dpo - 1:2,
                              kh:kh + 2 * hpo - 1:2,
                              kw:kw + 2 * wpo - 1:2])
    a = jnp.stack(taps, axis=0).reshape(27, ci, n, sp_out_true)
    a = jnp.pad(a, ((0, 0), (0, 0), (0, 0), (0, sp_out - sp_out_true)))
    return a.reshape(27, ci, n * sp_out)


def _interior_mask(out_dims, sp, n_rep):
    Do, Ho, Wo = out_dims
    dpo, hpo, wpo = Do + 2, Ho + 2, Wo + 2
    sp_true = dpo * hpo * wpo
    m = jnp.zeros((dpo, hpo, wpo), jnp.float32)
    m = m.at[1:-1, 1:-1, 1:-1].set(1.0)
    m = jnp.pad(m.reshape(1, sp_true), ((0, 0), (0, sp - sp_true)))
    if n_rep > 1:
        m = jnp.tile(m, (1, n_rep))
    return m


def adaptive_avg_pool3d_cnf(x, out_size):
    """PyTorch AdaptiveAvgPool3d semantics on (C, N, D, H, W) input (tiny; JAX glue)."""
    C, N, D, H, W = x.shape

    def bins(n_in, n_out):
        return [((i * n_in) // n_out, -((-(i + 1) * n_in) // n_out)) for i in range(n_out)]

    db, hb, wb = bins(D, out_size[0]), bins(H, out_size[1]), bins(W, out_size[2])
    planes_d = []
    for (d0, d1) in db:
        planes_h = []
        for (h0, h1) in hb:
            row_w = [x[:, :, d0:d1, h0:h1, w0:w1].mean(axis=(2, 3, 4)) for (w0, w1) in wb]
            planes_h.append(jnp.stack(row_w, axis=2))        # (C, N, ow)
        planes_d.append(jnp.stack(planes_h, axis=2))         # (C, N, oh, ow)
    return jnp.stack(planes_d, axis=2)                       # (C, N, od, oh, ow)


# --------------------------------------------------------------------------------------
# Parameters (BN folded into bf16 weights; channel-padded; tap-major layout)
# --------------------------------------------------------------------------------------
def _bn_fold(key, c):
    if not BATCHNORM:
        return jnp.ones((c,), jnp.float32), jnp.zeros((c,), jnp.float32)
    k1, k2, k3, k4 = jax.random.split(key, 4)
    gamma = 1.0 + 0.1 * jax.random.normal(k1, (c,), jnp.float32)
    beta = 0.1 * jax.random.normal(k2, (c,), jnp.float32)
    mean = 0.1 * jax.random.normal(k3, (c,), jnp.float32)
    var = jax.random.uniform(k4, (c,), jnp.float32, minval=0.5, maxval=1.5)
    scale = gamma * jax.lax.rsqrt(var + 1e-5)
    shift = beta - mean * scale
    return scale, shift


def _pack_conv(w, scale, cin, cout, ci_pad, co_pad):
    """(cout, cin, 3,3,3) f32 * BN scale -> (27, co_pad, ci_pad) bf16, tap-major (kd,kh,kw)."""
    w = w * scale[:, None, None, None, None]
    w = jnp.transpose(w, (2, 3, 4, 0, 1)).reshape(27, cout, cin)
    out = jnp.zeros((27, co_pad, ci_pad), jnp.float32).at[:, :cout, :cin].set(w)
    return out.astype(jnp.bfloat16)


def init_block_params(key, cin, planes):
    ci, co = _cpad(cin), _cpad(planes)
    k1, k2, k3, k4 = jax.random.split(key, 4)
    w1 = jax.random.normal(k1, (planes, cin, 3, 3, 3), jnp.float32) * math.sqrt(2.0 / (27 * cin))
    s1, b1 = _bn_fold(k2, planes)
    w2 = jax.random.normal(k3, (planes, planes, 3, 3, 3), jnp.float32) * math.sqrt(2.0 / (27 * planes))
    s2, b2 = _bn_fold(k4, planes)
    sh1 = jnp.zeros((co, 1), jnp.float32).at[:planes, 0].set(b1)
    sh2 = jnp.zeros((co, 1), jnp.float32).at[:planes, 0].set(b2)
    # residual injection: identity on the first in_planes channels (zero channel pad above)
    inj = jnp.zeros((co, ci), jnp.float32).at[jnp.arange(cin), jnp.arange(cin)].set(1.0)
    return dict(
        w1=_pack_conv(w1, s1, cin, planes, ci, co),
        b1=sh1,
        w2=_pack_conv(w2, s2, planes, planes, co, co),
        b2=sh2,
        inj=inj.astype(jnp.bfloat16),
    )


def init_params(key):
    cfgs = _block_cfg()
    keys = jax.random.split(key, len(cfgs) + 1)
    blocks = [init_block_params(k, cin, planes) for k, (cin, planes, _s) in zip(keys[:-1], cfgs)]
    kfc1, kfc2 = jax.random.split(keys[-1], 2)
    feat = LAYERS[-1] * 8
    fc_w = jax.random.normal(kfc1, (feat, 1), jnp.float32) / math.sqrt(feat)
    fc_b = 0.01 * jax.random.normal(kfc2, (1,), jnp.float32)
    return dict(blocks=blocks, fc_w=fc_w, fc_b=fc_b)


# --------------------------------------------------------------------------------------
# Forward pass
# --------------------------------------------------------------------------------------
def forward(params, x_ncdhw):
    cfgs = _block_cfg()
    N = x_ncdhw.shape[0]
    cur, dims, sp = _prepare_input(x_ncdhw, _cpad(cfgs[0][0]))

    for (cin, planes, stride), bp in zip(cfgs, params["blocks"]):
        ci, co = _cpad(cin), _cpad(planes)
        if stride == 1:
            out_dims, sp_out = dims, sp
            src, stride1 = cur, True
        else:
            out_dims = tuple(_conv_out(d, stride) for d in dims)
            dpo = tuple(d + 2 for d in out_dims)
            sp_out = _ceil_to(dpo[0] * dpo[1] * dpo[2], _LANE)
            src = _stride2_patches(cur, ci, N, dims, sp, out_dims, sp_out)
            stride1 = False

        # Split the lane axis per batch sample only when the per-step slab is big enough
        # to amortize a grid step (v7x megacore); tiny blocks run as a single grid step.
        split = (N > 1) and (sp_out >= 4096)
        n_steps = N if split else 1
        sp_blk = sp_out if split else N * sp_out

        dpo = tuple(d + 2 for d in out_dims)
        offs = _tap_offsets(*dpo)
        mask = _interior_mask(out_dims, sp_out, 1 if split else N)

        cur = fused_basic_block(src, bp["w1"], bp["b1"], bp["w2"], bp["b2"], bp["inj"],
                                mask, stride1=stride1, co=co, offs=offs,
                                n_steps=n_steps, sp=sp_blk)
        dims, sp = out_dims, sp_out

    # ---- extract interior, adaptive-avg-pool to (2,2,2), classifier ----
    planes_last = cfgs[-1][1]
    Do, Ho, Wo = dims
    dpo, hpo, wpo = Do + 2, Ho + 2, Wo + 2
    sp_true = dpo * hpo * wpo
    y = cur.reshape(_cpad(planes_last), N, sp)[:, :, :sp_true]
    y = y.reshape(-1, N, dpo, hpo, wpo)[:planes_last, :, 1:-1, 1:-1, 1:-1].astype(jnp.float32)
    pooled = adaptive_avg_pool3d_cnf(y, (2, 2, 2))            # (C, N, 2, 2, 2)
    feat = jnp.transpose(pooled, (1, 0, 2, 3, 4)).reshape(N, -1)   # PyTorch flatten order
    # TODO(synk): blocks 2-4 could be folded into a single tail pallas_call together with
    # the pool/FC; at these sizes the 2x256x1 FC in a pallas_call is pure launch overhead.
    return feat @ params["fc_w"] + params["fc_b"]             # (N, 1)


if __name__ == "__main__":
    _ROLL_SIGN = _probe_roll_sign()

    key = jax.random.PRNGKey(0)
    kx, kp = jax.random.split(key)
    # PyTorch-style NCDHW input: single-channel 3D volume.
    x = jax.random.normal(kx, (2, 1, 16, 16, 16), jnp.float32)
    params = init_params(kp)
    out = jax.jit(forward)(params, x)
    out = jax.block_until_ready(out)
    assert out.shape == (2, 1)
    assert bool(jnp.all(jnp.isfinite(out)))
    print("KERNEL_OK")
</pallas_src>

<mosaic_0001>
module attributes {stable_mosaic.version = 11 : i64} {
  func.func @k(%arg0: memref<8x128xf32, #tpu.memory_space<vmem>>, %arg1: memref<8x128xf32, #tpu.memory_space<vmem>>) attributes {dimension_semantics = [], scalar_prefetch = 0 : i64, scratch_operands = 0 : i64, tpu.core_type = #tpu.core_type<tc>} {
    %c0 = arith.constant 0 : index
    %c0_0 = arith.constant 0 : index
    %0 = vector.load %arg0[%c0, %c0_0] : memref<8x128xf32, #tpu.memory_space<vmem>>, vector<8x128xf32>
    %c1_i32 = arith.constant 1 : i32
    %1 = tpu.dynamic_rotate %0 by %c1_i32 dim 1 : vector<8x128xf32>, i32 -> vector<8x128xf32>
    %c0_1 = arith.constant 0 : index
    %c0_2 = arith.constant 0 : index
    %2 = vector.load %arg1[%c0_1, %c0_2] : memref<8x128xf32, #tpu.memory_space<vmem>>, vector<8x128xf32>
    tpu.vector_store %arg1[%c0_1, %c0_2], %1 {strides = array<i32>} : memref<8x128xf32, #tpu.memory_space<vmem>>, vector<8x128xf32>,
    return
  }
}

</mosaic_0001>

<bundles_post_ra>
// kernel: tpu_custom_call.1
= control target key start
LH: loop header
LB: loop body
LE: loop exit
PB: predicated region body
PF: predicated region fallthrough
CT: control target
= control target key end

     0   :  { %6 = vsyncpa [#allocation3], 0  ;;  %s128_s0 = inlined_call_operand.hbm [shape: f32[8,128], index: 0, kind: input, shape index: {}]   ;;  %s129_s1 = inlined_call_operand.hbm [shape: f32[8,128], index: 1, kind: output, shape index: {}]  }
   0x1   :  { %7 = vsyncpa [#allocation4], 0  ;;  %s91_s6 = smov [#allocation2]   ;;  %s43_s10 = scalar_lea.hbm %s128_s0, 128 }
   0x2   :  { %s14_s7 = sshll.u32 %s91_s6, 4  ;;  %p44_p0 = scmp.ne.s32.totalorder %s128_s0, %s43_s10  ;;  %s15_s7 = int_to_ptr.vmem [resolvable:$true] %s14_s7 }
   0x3   :  { %p47_p1 = scmp.lt.u32.totalorder %s43_s10, %s128_s0 }
   0x5   :  { %p49_p2 = pnand %p47_p1, %p44_p0 }
   0x7   :  { %52 = shalt.err (!%p49_p2)
}
   0x8   :  { %s53_s15 = scalar_lea.vmem %s15_s7, 128  ;;  %p58_p4 = scmp.lt.s32.totalorder %s15_s7, %s15_s7 }
   0x9   :  { %p54_p3 = scmp.ne.s32.totalorder %s15_s7, %s53_s15  ;;  %p59_p5 = scmp.lt.s32.totalorder %s53_s15, %s53_s15 }
   0xb   :  { %p60_p6 = por %p59_p5, %p58_p4 }
   0xd   :  { %p61_p7 = pnand %p60_p6, %p54_p3 }
   0xf   :  { %64 = shalt.err (!%p61_p7)
}
  0x10   :  { %17 = dma.hbm_to_vmem [thread:$0]  %s128_s0, 128, %s15_s7, [#allocation3]  }
  0x11   :  { %87 = dma.done.wait [#allocation3], 128  }
  0x12   :  { %88 = vsyncadd [#allocation3], 4294967168  ;;  %v21_v0 = vld [vmem:[#allocation2] sm:$0xff]  ;;  %s92_s18 = smov 1   ;;  %s93_s19 = smov [#allocation5]  }
  0x13   :  { %22 = vrot.lane.b32.xlu0 %v21_v0, %s92_s18  ;;  %s31_s20 = sshll.u32 %s93_s19, 4  ;;  %s32_s20 = int_to_ptr.vmem [resolvable:$true] %s31_s20 }
  0x14   :  { %s65_s21 = scalar_lea.vmem %s32_s20, 128  ;;  %p70_p9 = scmp.lt.s32.totalorder %s32_s20, %s32_s20 }
  0x15   :  { %p66_p8 = scmp.ne.s32.totalorder %s32_s20, %s65_s21  ;;  %p71_p10 = scmp.lt.s32.totalorder %s65_s21, %s65_s21 }
  0x17   :  { %p72_p11 = por %p71_p10, %p70_p9 }
  0x19   :  { %p73_p12 = pnand %p72_p11, %p66_p8 }
  0x85   :  { %v23_v1 = vpop.permute.xlu0 %22 }
  0x86   :  { %24 = vst [vmem:[#allocation5] sm:$0xff] %v23_v1 }
  0x87   :  { %76 = shalt.err (!%p73_p12)
}
  0x88   :  { %s77_s0 = scalar_lea.hbm %s129_s1, 128 }
  0x89   :  { %p78_p13 = scmp.ne.s32.totalorder %s129_s1, %s77_s0  ;;  %p81_p0 = scmp.lt.u32.totalorder %s77_s0, %s129_s1 }
  0x8b   :  { %p83_p1 = pnand %p81_p0, %p78_p13 }
  0x8d   :  { %86 = shalt.err (!%p83_p1)
}
  0x8e   :  { %34 = dma.vmem_to_hbm [thread:$0]  %s32_s20, 128, %s129_s1, [#allocation4]  }
  0x8f   :  { %89 = dma.done.wait [#allocation4], 128  }
  0x90   :  { %90 = vsyncadd [#allocation4], 4294967168 }
  0x91   :  { %38 = vsyncpa [#allocation3], 1 }
  0x92   :  { %39 = vsyncpa [#allocation4], 1 }

</bundles_post_ra>
